<compile_context>
chip_gen: v7x
topology: tpu7x:2x2x1
jax: 0.10.0
libtpu: 0.0.40
codegen_flags: <defaults>
</compile_context>

<pallas_src>
import jax
import jax.numpy as jnp
from jax import lax
from jax.experimental import pallas as pl
from jax.experimental.pallas import tpu as pltpu


def _make_kernel(taps, margin, np_total):
    """Kernel closure over static geometry (tap offsets, scratch margin, lanes)."""

    def kernel(x_ref, mask_ref, w1_ref, b1_ref, w2_ref, b2_ref, w3_ref, b3_ref,
               o_ref, hpad_ref, patch_ref):
        p = w1_ref.shape[0]                      # planes
        x = x_ref[...]                           # (Cin, NP), f32

        # ---- conv1 (1x1, BN1 scale folded into w1) + bias + relu ----
        # Zero the halo / tail columns so conv2's zero-padding semantics hold.
        h1 = jnp.dot(w1_ref[...], x, preferred_element_type=jnp.float32)
        h1 = jnp.maximum(h1 + b1_ref[...], 0.0) * mask_ref[...]      # (P, NP)

        # ---- conv2 (3x3, stride=1, pad=1) as ONE im2col matmul ----
        # Copy h1 into a lane-margin scratch, gather the 9 shifted windows
        # into a (9*P, NP) patch buffer, then a single K=9*P MXU matmul.
        hpad_ref[...] = jnp.zeros_like(hpad_ref)     # grid=(1,): runs once
        hpad_ref[:, margin:margin + np_total] = h1   # 128-aligned lane store
        for k, d in enumerate(taps):
            patch_ref[k * p:(k + 1) * p, :] = (
                hpad_ref[:, margin + d:margin + d + np_total])
        h2 = jnp.dot(w2_ref[...], patch_ref[...],
                     preferred_element_type=jnp.float32)             # (P, NP)
        h2 = jnp.maximum(h2 + b2_ref[...], 0.0)

        # ---- conv3 (1x1, BN3 scale folded) + bias + residual + relu ----
        h3 = jnp.dot(w3_ref[...], h2, preferred_element_type=jnp.float32)
        o_ref[...] = jnp.maximum(h3 + b3_ref[...] + x, 0.0).astype(o_ref.dtype)

    return kernel


def _fold_bn(bn, eps=1e-5):
    gamma, beta, mean, var = bn
    s = gamma / jnp.sqrt(var + eps)
    b = beta - mean * s
    return s, b


def bottleneck_pallas(x_nhwc, w1, w2, w3, bn1, bn2, bn3, eps=1e-5):
    N, H, W, Cin = x_nhwc.shape
    P = w1.shape[1]
    Cout = w3.shape[1]
    assert Cout == Cin, "residual add requires inplanes == planes * expansion"

    Hp, Wp = H + 2, W + 2
    n_pad = N * Hp * Wp                               # padded-flat spatial size
    NP = ((n_pad + 127) // 128) * 128                 # lane-dense (multiple of 128)
    margin = ((Wp + 1 + 127) // 128) * 128            # >= max |tap offset|, aligned

    # ---- fold BN (eval) scales into conv weights; pre-transpose for (C, spatial) ----
    s1, b1 = _fold_bn(bn1, eps)
    s2, b2 = _fold_bn(bn2, eps)
    s3, b3 = _fold_bn(bn3, eps)
    w1f = (s1[:, None] * w1.T).astype(jnp.float32)                       # (P, Cin)
    w2r = w2.reshape(9, P, P)                                            # (tap, in, out)
    w2f = (s2[:, None] *
           jnp.transpose(w2r, (2, 0, 1)).reshape(P, 9 * P)).astype(jnp.float32)  # (P, 9P)
    w3f = (s3[:, None] * w3.T).astype(jnp.float32)                       # (Cout, P)
    b1c = b1.reshape(P, 1).astype(jnp.float32)
    b2c = b2.reshape(P, 1).astype(jnp.float32)
    b3c = b3.reshape(Cout, 1).astype(jnp.float32)

    # ---- layout plumbing (wrapper-side, cheap XLA ops) ----
    # NHWC -> zero-halo padded -> (Cin, N*Hp*Wp) -> lane-pad to NP.
    x_pad = jnp.pad(x_nhwc, ((0, 0), (1, 1), (1, 1), (0, 0)))
    x_flat = x_pad.reshape(N * Hp * Wp, Cin).T
    x_flat = jnp.pad(x_flat, ((0, 0), (0, NP - n_pad))).astype(jnp.float32)

    # Interior mask over padded-flat positions (1 inside the image, 0 on halo/tail).
    hh = jnp.arange(Hp)
    ww = jnp.arange(Wp)
    m2d = ((hh >= 1) & (hh <= H))[:, None] & ((ww >= 1) & (ww <= W))[None, :]
    mask = jnp.tile(m2d.reshape(-1), (N,))
    mask = jnp.pad(mask, (0, NP - n_pad)).astype(jnp.float32).reshape(1, NP)

    # Flat offsets of the 9 conv2 taps on the padded grid.
    taps = tuple((ki - 1) * Wp + (kj - 1) for ki in range(3) for kj in range(3))

    kernel = _make_kernel(taps, margin, NP)

    def fullspec(a):
        nd = a.ndim
        return pl.BlockSpec(a.shape, lambda i, _nd=nd: (0,) * _nd)

    out_flat = pl.pallas_call(
        kernel,
        out_shape=jax.ShapeDtypeStruct((Cout, NP), jnp.float32),
        grid_spec=pltpu.PrefetchScalarGridSpec(
            num_scalar_prefetch=0,
            grid=(1,),          # whole batch folded into the matmul lane dim
            in_specs=[
                fullspec(x_flat), fullspec(mask),
                fullspec(w1f), fullspec(b1c),
                fullspec(w2f), fullspec(b2c),
                fullspec(w3f), fullspec(b3c),
            ],
            out_specs=pl.BlockSpec((Cout, NP), lambda i: (0, 0)),
            scratch_shapes=[
                pltpu.VMEM((P, NP + 2 * margin), jnp.float32),   # margin-padded h1
                pltpu.VMEM((9 * P, NP), jnp.float32),            # im2col patches
            ],
        ),
        compiler_params=pltpu.CompilerParams(dimension_semantics=("arbitrary",)),
    )(x_flat, mask, w1f, b1c, w2f, b2c, w3f, b3c)

    # Strip lane padding and spatial halos, back to NHWC.
    out = out_flat[:, :n_pad].T.reshape(N, Hp, Wp, Cout)[:, 1:-1, 1:-1, :]
    return out.astype(x_nhwc.dtype)


def bottleneck_ref(x_nhwc, w1, w2, w3, bn1, bn2, bn3, eps=1e-5):
    """Pure-JAX reference (eval-mode BN)."""
    s1, t1 = _fold_bn(bn1, eps)
    s2, t2 = _fold_bn(bn2, eps)
    s3, t3 = _fold_bn(bn3, eps)
    h1 = jnp.maximum(jnp.einsum('nhwc,cp->nhwp', x_nhwc, w1) * s1 + t1, 0.0)
    h2 = lax.conv_general_dilated(h1, w2, (1, 1), ((1, 1), (1, 1)),
                                  dimension_numbers=('NHWC', 'HWIO', 'NHWC'))
    h2 = jnp.maximum(h2 * s2 + t2, 0.0)
    h3 = jnp.einsum('nhwp,pq->nhwq', h2, w3) * s3 + t3
    return jnp.maximum(h3 + x_nhwc, 0.0)


if __name__ == "__main__":
    key = jax.random.PRNGKey(0)
    N, H, W = 2, 16, 16
    planes = 4
    inplanes = planes * 4  # expansion = 4, so residual add is shape-compatible
    ks = jax.random.split(key, 8)

    # PyTorch-style NCHW input
    x_nchw = jax.random.normal(ks[0], (N, inplanes, H, W), jnp.float32)

    # conv weights (bias=False), stored as matmul-ready layouts:
    #   w1: (Cin, P)      == torch conv1.weight[:, :, 0, 0].T
    #   w2: (3, 3, P, P)  == torch conv2.weight transposed to HWIO
    #   w3: (P, 4P)       == torch conv3.weight[:, :, 0, 0].T
    w1 = jax.random.normal(ks[1], (inplanes, planes), jnp.float32) / (inplanes ** 0.5)
    w2 = jax.random.normal(ks[2], (3, 3, planes, planes), jnp.float32) / ((9 * planes) ** 0.5)
    w3 = jax.random.normal(ks[3], (planes, planes * 4), jnp.float32) / (planes ** 0.5)

    def bn_params(k, C):
        k1, k2, k3, k4 = jax.random.split(k, 4)
        gamma = jax.random.uniform(k1, (C,), jnp.float32, 0.5, 1.5)
        beta = jax.random.normal(k2, (C,), jnp.float32) * 0.1
        mean = jax.random.normal(k3, (C,), jnp.float32) * 0.1
        var = jax.random.uniform(k4, (C,), jnp.float32, 0.5, 1.5)
        return (gamma, beta, mean, var)

    bn1 = bn_params(ks[4], planes)
    bn2 = bn_params(ks[5], planes)
    bn3 = bn_params(ks[6], planes * 4)

    # NCHW -> NHWC for the kernel
    x_nhwc = jnp.transpose(x_nchw, (0, 2, 3, 1))

    out = bottleneck_pallas(x_nhwc, w1, w2, w3, bn1, bn2, bn3)
    out = jax.block_until_ready(out)

    ref = bottleneck_ref(x_nhwc, w1, w2, w3, bn1, bn2, bn3)
    max_err = float(jnp.max(jnp.abs(out - ref)))
    assert jnp.allclose(out, ref, atol=1e-4, rtol=1e-4), f"max_err={max_err}"

    out_nchw = jnp.transpose(out, (0, 3, 1, 2))  # back to PyTorch NCHW
    assert out_nchw.shape == (N, inplanes, H, W)
    print("KERNEL_OK")
</pallas_src>

<mosaic_0001>
module attributes {stable_mosaic.version = 11 : i64} {
  func.func @kernel(%arg0: i32, %arg1: memref<16x768xf32, #tpu.memory_space<vmem>>, %arg2: memref<1x768xf32, #tpu.memory_space<vmem>>, %arg3: memref<4x16xf32, #tpu.memory_space<vmem>>, %arg4: memref<4x1xf32, #tpu.memory_space<vmem>>, %arg5: memref<4x36xf32, #tpu.memory_space<vmem>>, %arg6: memref<4x1xf32, #tpu.memory_space<vmem>>, %arg7: memref<16x4xf32, #tpu.memory_space<vmem>>, %arg8: memref<16x1xf32, #tpu.memory_space<vmem>>, %arg9: memref<16x768xf32, #tpu.memory_space<vmem>>, %arg10: memref<4x1024xf32, #tpu.memory_space<vmem>>, %arg11: memref<36x768xf32, #tpu.memory_space<vmem>>) attributes {dimension_semantics = [#tpu.dimension_semantics<arbitrary>], iteration_bounds = array<i64: 1>, scalar_prefetch = 0 : i64, scratch_operands = 2 : i64, tpu.core_type = #tpu.core_type<tc>, window_params = [{pipeline_mode = #tpu.pipeline_mode<synchronous>, transform_indices = @transform_0, window_bounds = array<i64: 16, 768>}, {pipeline_mode = #tpu.pipeline_mode<synchronous>, transform_indices = @transform_1, window_bounds = array<i64: 1, 768>}, {pipeline_mode = #tpu.pipeline_mode<synchronous>, transform_indices = @transform_2, window_bounds = array<i64: 4, 16>}, {pipeline_mode = #tpu.pipeline_mode<synchronous>, transform_indices = @transform_3, window_bounds = array<i64: 4, 1>}, {pipeline_mode = #tpu.pipeline_mode<synchronous>, transform_indices = @transform_4, window_bounds = array<i64: 4, 36>}, {pipeline_mode = #tpu.pipeline_mode<synchronous>, transform_indices = @transform_5, window_bounds = array<i64: 4, 1>}, {pipeline_mode = #tpu.pipeline_mode<synchronous>, transform_indices = @transform_6, window_bounds = array<i64: 16, 4>}, {pipeline_mode = #tpu.pipeline_mode<synchronous>, transform_indices = @transform_7, window_bounds = array<i64: 16, 1>}, {pipeline_mode = #tpu.pipeline_mode<synchronous>, transform_indices = @transform_8, window_bounds = array<i64: 16, 768>}]} {
    %c0 = arith.constant 0 : index
    %c0_0 = arith.constant 0 : index
    %0 = vector.load %arg1[%c0, %c0_0] : memref<16x768xf32, #tpu.memory_space<vmem>>, vector<16x768xf32>
    %c0_1 = arith.constant 0 : index
    %c0_2 = arith.constant 0 : index
    %1 = vector.load %arg3[%c0_1, %c0_2] : memref<4x16xf32, #tpu.memory_space<vmem>>, vector<4x16xf32>
    %cst = arith.constant dense<0.000000e+00> : vector<4x768xf32>
    %2 = tpu.matmul %1, %0, %cst {dimension_numbers = #tpu.dot_dimension_numbers<[1], [0], [0], [1], [0, 0, 1, 1], [], []>} : vector<4x16xf32>, vector<16x768xf32>, vector<4x768xf32> -> vector<4x768xf32>
    %c0_3 = arith.constant 0 : index
    %c0_4 = arith.constant 0 : index
    %3 = vector.load %arg4[%c0_3, %c0_4] : memref<4x1xf32, #tpu.memory_space<vmem>>, vector<4x1xf32>
    %4 = vector.broadcast %3 : vector<4x1xf32> to vector<4x768xf32>
    %5 = arith.addf %2, %4 : vector<4x768xf32>
    %cst_5 = arith.constant 0.000000e+00 : f32
    %6 = vector.broadcast %cst_5 : f32 to vector<4x768xf32>
    %7 = arith.maximumf %5, %6 : vector<4x768xf32>
    %c0_6 = arith.constant 0 : index
    %c0_7 = arith.constant 0 : index
    %8 = vector.load %arg2[%c0_6, %c0_7] : memref<1x768xf32, #tpu.memory_space<vmem>>, vector<1x768xf32>
    %9 = vector.broadcast %8 : vector<1x768xf32> to vector<4x768xf32>
    %10 = arith.mulf %7, %9 : vector<4x768xf32>
    %cst_8 = arith.constant 0.000000e+00 : f32
    %11 = vector.broadcast %cst_8 : f32 to vector<4x1024xf32>
    %c0_9 = arith.constant 0 : index
    %c0_10 = arith.constant 0 : index
    %12 = vector.load %arg10[%c0_9, %c0_10] : memref<4x1024xf32, #tpu.memory_space<vmem>>, vector<4x1024xf32>
    tpu.vector_store %arg10[%c0_9, %c0_10], %11 {strides = array<i32>} : memref<4x1024xf32, #tpu.memory_space<vmem>>, vector<4x1024xf32>,
    %c0_11 = arith.constant 0 : index
    %c128 = arith.constant 128 : index
    %13 = vector.load %arg10[%c0_11, %c128] : memref<4x1024xf32, #tpu.memory_space<vmem>>, vector<4x768xf32>
    tpu.vector_store %arg10[%c0_11, %c128], %10 {strides = array<i32>} : memref<4x1024xf32, #tpu.memory_space<vmem>>, vector<4x768xf32>,
    %c0_12 = arith.constant 0 : index
    %c109 = arith.constant 109 : index
    %14 = vector.load %arg10[%c0_12, %c109] : memref<4x1024xf32, #tpu.memory_space<vmem>>, vector<4x768xf32>
    %c0_13 = arith.constant 0 : index
    %c0_14 = arith.constant 0 : index
    %15 = vector.load %arg11[%c0_13, %c0_14] : memref<36x768xf32, #tpu.memory_space<vmem>>, vector<4x768xf32>
    tpu.vector_store %arg11[%c0_13, %c0_14], %14 {strides = array<i32>} : memref<36x768xf32, #tpu.memory_space<vmem>>, vector<4x768xf32>,
    %c0_15 = arith.constant 0 : index
    %c110 = arith.constant 110 : index
    %16 = vector.load %arg10[%c0_15, %c110] : memref<4x1024xf32, #tpu.memory_space<vmem>>, vector<4x768xf32>
    %c4 = arith.constant 4 : index
    %c0_16 = arith.constant 0 : index
    %17 = vector.load %arg11[%c4, %c0_16] : memref<36x768xf32, #tpu.memory_space<vmem>>, vector<4x768xf32>
    tpu.vector_store %arg11[%c4, %c0_16], %16 {strides = array<i32>} : memref<36x768xf32, #tpu.memory_space<vmem>>, vector<4x768xf32>,
    %c0_17 = arith.constant 0 : index
    %c111 = arith.constant 111 : index
    %18 = vector.load %arg10[%c0_17, %c111] : memref<4x1024xf32, #tpu.memory_space<vmem>>, vector<4x768xf32>
    %c8 = arith.constant 8 : index
    %c0_18 = arith.constant 0 : index
    %19 = vector.load %arg11[%c8, %c0_18] : memref<36x768xf32, #tpu.memory_space<vmem>>, vector<4x768xf32>
    tpu.vector_store %arg11[%c8, %c0_18], %18 {strides = array<i32>} : memref<36x768xf32, #tpu.memory_space<vmem>>, vector<4x768xf32>,
    %c0_19 = arith.constant 0 : index
    %c127 = arith.constant 127 : index
    %20 = vector.load %arg10[%c0_19, %c127] : memref<4x1024xf32, #tpu.memory_space<vmem>>, vector<4x768xf32>
    %c12 = arith.constant 12 : index
    %c0_20 = arith.constant 0 : index
    %21 = vector.load %arg11[%c12, %c0_20] : memref<36x768xf32, #tpu.memory_space<vmem>>, vector<4x768xf32>
    tpu.vector_store %arg11[%c12, %c0_20], %20 {strides = array<i32>} : memref<36x768xf32, #tpu.memory_space<vmem>>, vector<4x768xf32>,
    %c0_21 = arith.constant 0 : index
    %c128_22 = arith.constant 128 : index
    %22 = vector.load %arg10[%c0_21, %c128_22] : memref<4x1024xf32, #tpu.memory_space<vmem>>, vector<4x768xf32>
    %c16 = arith.constant 16 : index
    %c0_23 = arith.constant 0 : index
    %23 = vector.load %arg11[%c16, %c0_23] : memref<36x768xf32, #tpu.memory_space<vmem>>, vector<4x768xf32>
    tpu.vector_store %arg11[%c16, %c0_23], %22 {strides = array<i32>} : memref<36x768xf32, #tpu.memory_space<vmem>>, vector<4x768xf32>,
    %c0_24 = arith.constant 0 : index
    %c129 = arith.constant 129 : index
    %24 = vector.load %arg10[%c0_24, %c129] : memref<4x1024xf32, #tpu.memory_space<vmem>>, vector<4x768xf32>
    %c20 = arith.constant 20 : index
    %c0_25 = arith.constant 0 : index
    %25 = vector.load %arg11[%c20, %c0_25] : memref<36x768xf32, #tpu.memory_space<vmem>>, vector<4x768xf32>
    tpu.vector_store %arg11[%c20, %c0_25], %24 {strides = array<i32>} : memref<36x768xf32, #tpu.memory_space<vmem>>, vector<4x768xf32>,
    %c0_26 = arith.constant 0 : index
    %c145 = arith.constant 145 : index
    %26 = vector.load %arg10[%c0_26, %c145] : memref<4x1024xf32, #tpu.memory_space<vmem>>, vector<4x768xf32>
    %c24 = arith.constant 24 : index
    %c0_27 = arith.constant 0 : index
    %27 = vector.load %arg11[%c24, %c0_27] : memref<36x768xf32, #tpu.memory_space<vmem>>, vector<4x768xf32>
    tpu.vector_store %arg11[%c24, %c0_27], %26 {strides = array<i32>} : memref<36x768xf32, #tpu.memory_space<vmem>>, vector<4x768xf32>,
    %c0_28 = arith.constant 0 : index
    %c146 = arith.constant 146 : index
    %28 = vector.load %arg10[%c0_28, %c146] : memref<4x1024xf32, #tpu.memory_space<vmem>>, vector<4x768xf32>
    %c28 = arith.constant 28 : index
    %c0_29 = arith.constant 0 : index
    %29 = vector.load %arg11[%c28, %c0_29] : memref<36x768xf32, #tpu.memory_space<vmem>>, vector<4x768xf32>
    tpu.vector_store %arg11[%c28, %c0_29], %28 {strides = array<i32>} : memref<36x768xf32, #tpu.memory_space<vmem>>, vector<4x768xf32>,
    %c0_30 = arith.constant 0 : index
    %c147 = arith.constant 147 : index
    %30 = vector.load %arg10[%c0_30, %c147] : memref<4x1024xf32, #tpu.memory_space<vmem>>, vector<4x768xf32>
    %c32 = arith.constant 32 : index
    %c0_31 = arith.constant 0 : index
    %31 = vector.load %arg11[%c32, %c0_31] : memref<36x768xf32, #tpu.memory_space<vmem>>, vector<4x768xf32>
    tpu.vector_store %arg11[%c32, %c0_31], %30 {strides = array<i32>} : memref<36x768xf32, #tpu.memory_space<vmem>>, vector<4x768xf32>,
    %c0_32 = arith.constant 0 : index
    %c0_33 = arith.constant 0 : index
    %32 = vector.load %arg5[%c0_32, %c0_33] : memref<4x36xf32, #tpu.memory_space<vmem>>, vector<4x36xf32>
    %c0_34 = arith.constant 0 : index
    %c0_35 = arith.constant 0 : index
    %33 = vector.load %arg11[%c0_34, %c0_35] : memref<36x768xf32, #tpu.memory_space<vmem>>, vector<36x768xf32>
    %cst_36 = arith.constant dense<0.000000e+00> : vector<4x768xf32>
    %34 = tpu.matmul %32, %33, %cst_36 {dimension_numbers = #tpu.dot_dimension_numbers<[1], [0], [0], [1], [0, 0, 1, 1], [], []>} : vector<4x36xf32>, vector<36x768xf32>, vector<4x768xf32> -> vector<4x768xf32>
    %c0_37 = arith.constant 0 : index
    %c0_38 = arith.constant 0 : index
    %35 = vector.load %arg6[%c0_37, %c0_38] : memref<4x1xf32, #tpu.memory_space<vmem>>, vector<4x1xf32>
    %36 = vector.broadcast %35 : vector<4x1xf32> to vector<4x768xf32>
    %37 = arith.addf %34, %36 : vector<4x768xf32>
    %cst_39 = arith.constant 0.000000e+00 : f32
    %38 = vector.broadcast %cst_39 : f32 to vector<4x768xf32>
    %39 = arith.maximumf %37, %38 : vector<4x768xf32>
    %c0_40 = arith.constant 0 : index
    %c0_41 = arith.constant 0 : index
    %40 = vector.load %arg7[%c0_40, %c0_41] : memref<16x4xf32, #tpu.memory_space<vmem>>, vector<16x4xf32>
    %cst_42 = arith.constant dense<0.000000e+00> : vector<16x768xf32>
    %41 = tpu.matmul %40, %39, %cst_42 {dimension_numbers = #tpu.dot_dimension_numbers<[1], [0], [0], [1], [0, 0, 1, 1], [], []>} : vector<16x4xf32>, vector<4x768xf32>, vector<16x768xf32> -> vector<16x768xf32>
    %c0_43 = arith.constant 0 : index
    %c0_44 = arith.constant 0 : index
    %42 = vector.load %arg8[%c0_43, %c0_44] : memref<16x1xf32, #tpu.memory_space<vmem>>, vector<16x1xf32>
    %43 = vector.broadcast %42 : vector<16x1xf32> to vector<16x768xf32>
    %44 = arith.addf %41, %43 : vector<16x768xf32>
    %45 = arith.addf %44, %0 : vector<16x768xf32>
    %cst_45 = arith.constant 0.000000e+00 : f32
    %46 = vector.broadcast %cst_45 : f32 to vector<16x768xf32>
    %47 = arith.maximumf %45, %46 : vector<16x768xf32>
    %c0_46 = arith.constant 0 : index
    %c0_47 = arith.constant 0 : index
    %48 = vector.load %arg9[%c0_46, %c0_47] : memref<16x768xf32, #tpu.memory_space<vmem>>, vector<16x768xf32>
    tpu.vector_store %arg9[%c0_46, %c0_47], %47 {strides = array<i32>} : memref<16x768xf32, #tpu.memory_space<vmem>>, vector<16x768xf32>,
    return
  }
  func.func @transform_0(%arg0: i32) -> (i32, i32) {
    %c0_i32 = arith.constant 0 : i32
    %c0_i32_0 = arith.constant 0 : i32
    %c0_i32_1 = arith.constant 0 : i32
    return %c0_i32, %c0_i32_0 : i32, i32
  }
  func.func @transform_1(%arg0: i32) -> (i32, i32) {
    %c0_i32 = arith.constant 0 : i32
    %c0_i32_0 = arith.constant 0 : i32
    %c0_i32_1 = arith.constant 0 : i32
    return %c0_i32, %c0_i32_0 : i32, i32
  }
  func.func @transform_2(%arg0: i32) -> (i32, i32) {
    %c0_i32 = arith.constant 0 : i32
    %c0_i32_0 = arith.constant 0 : i32
    %c0_i32_1 = arith.constant 0 : i32
    return %c0_i32, %c0_i32_0 : i32, i32
  }
  func.func @transform_3(%arg0: i32) -> (i32, i32) {
    %c0_i32 = arith.constant 0 : i32
    %c0_i32_0 = arith.constant 0 : i32
    %c0_i32_1 = arith.constant 0 : i32
    return %c0_i32, %c0_i32_0 : i32, i32
  }
  func.func @transform_4(%arg0: i32) -> (i32, i32) {
    %c0_i32 = arith.constant 0 : i32
    %c0_i32_0 = arith.constant 0 : i32
    %c0_i32_1 = arith.constant 0 : i32
    return %c0_i32, %c0_i32_0 : i32, i32
  }
  func.func @transform_5(%arg0: i32) -> (i32, i32) {
    %c0_i32 = arith.constant 0 : i32
    %c0_i32_0 = arith.constant 0 : i32
    %c0_i32_1 = arith.constant 0 : i32
    return %c0_i32, %c0_i32_0 : i32, i32
  }
  func.func @transform_6(%arg0: i32) -> (i32, i32) {
    %c0_i32 = arith.constant 0 : i32
    %c0_i32_0 = arith.constant 0 : i32
    %c0_i32_1 = arith.constant 0 : i32
    return %c0_i32, %c0_i32_0 : i32, i32
  }
  func.func @transform_7(%arg0: i32) -> (i32, i32) {
    %c0_i32 = arith.constant 0 : i32
    %c0_i32_0 = arith.constant 0 : i32
    %c0_i32_1 = arith.constant 0 : i32
    return %c0_i32, %c0_i32_0 : i32, i32
  }
  func.func @transform_8(%arg0: i32) -> (i32, i32) {
    %c0_i32 = arith.constant 0 : i32
    %c0_i32_0 = arith.constant 0 : i32
    %c0_i32_1 = arith.constant 0 : i32
    return %c0_i32, %c0_i32_0 : i32, i32
  }
}

</mosaic_0001>

<bundles_post_ra>
// kernel: tpu_custom_call.1
= control target key start
LH: loop header
LB: loop body
LE: loop exit
PB: predicated region body
PF: predicated region fallthrough
CT: control target
= control target key end

     0   :  { %13 = vsyncpa [#allocation5], 0  ;;  %s1845_s0 = inlined_call_operand.hbm [shape: f32[16,768], index: 0, kind: input, shape index: {}]   ;;  %s1846_s1 = inlined_call_operand.vmem [shape: f32[1,768], index: 1, kind: input, shape index: {}]   ;;  %s1847_s2 = inlined_call_operand.vmem [shape: f32[4,16], index: 2, kind: input, shape index: {}]   ;;  %s1848_s3 = inlined_call_operand.vmem [shape: f32[4,1], index: 3, kind: input, shape index: {}]   ;;  %s1849_s4 = inlined_call_operand.vmem [shape: f32[4,36], index: 4, kind: input, shape index: {}]   ;;  %s1850_s5 = inlined_call_operand.vmem [shape: f32[4,1], index: 5, kind: input, shape index: {}]   ;;  %s1851_s6 = inlined_call_operand.vmem [shape: f32[16,4], index: 6, kind: input, shape index: {}]   ;;  %s1852_s7 = inlined_call_operand.vmem [shape: f32[16,1], index: 7, kind: input, shape index: {}]   ;;  %s1853_s8 = inlined_call_operand.hbm [shape: f32[16,768], index: 8, kind: output, shape index: {}]  }
   0x1   :  { %14 = vsyncpa [#allocation6], 0  ;;  %s1459_s27 = smov [#allocation4]   ;;  %s1411_s9 = scalar_lea.hbm %s1845_s0, 1536 }
   0x2   :  { %s20_s28 = sshll.u32 %s1459_s27, 4  ;;  %p1412_p0 = scmp.ne.s32.totalorder %s1845_s0, %s1411_s9  ;;  %s21_s28 = int_to_ptr.vmem [resolvable:$true] %s20_s28 }
   0x3   :  { %p1415_p1 = scmp.lt.u32.totalorder %s1411_s9, %s1845_s0 }
   0x5   :  { %p1417_p2 = pnand %p1415_p1, %p1412_p0 }
   0x7   :  { %1420 = shalt.err (!%p1417_p2)
}
   0x8   :  { %s1421_s14 = scalar_lea.vmem %s21_s28, 1536  ;;  %p1426_p4 = scmp.lt.s32.totalorder %s21_s28, %s21_s28 }
   0x9   :  { %p1422_p3 = scmp.ne.s32.totalorder %s21_s28, %s1421_s14  ;;  %p1427_p5 = scmp.lt.s32.totalorder %s1421_s14, %s1421_s14 }
   0xb   :  { %p1428_p6 = por %p1427_p5, %p1426_p4 }
   0xd   :  { %p1429_p7 = pnand %p1428_p6, %p1422_p3 }
   0xf   :  { %1432 = shalt.err (!%p1429_p7)
}
  0x10   :  { %s1460_s15 = smov 768   ;;  %s1461_s16 = smov 48  }
  0x11   :  { %26 = dma.hbm_to_vmem [thread:$0]  %s1845_s0, 1536, %s21_s28, [#allocation5], %s1460_s15, %s1460_s15, %s1461_s16  }
  0x12   :  { %1455 = dma.done.wait [#allocation5], 1536  }
  0x13   :  { %1456 = vsyncadd [#allocation5], 4294965760  ;;  %v1462_v0 = vmov 0.0   ;;  %v1463_v1 = vmov 0   ;;  %v1539_v2 = vld [vmem:[#allocation4 + $0x8] sm:$0xff]  ;;  %v1541_v3 = vld [vmem:[#allocation4 + $0x38] sm:$0xff]  ;;  %v288_v25 = vlaneseq }
  0x14   :  { %131 = vmatprep.mubr.f32.mxu0 %v1462_v0  ;;  %324 = vst [vmem:[#allocation2] sm:$0xff] %v1462_v0  ;;  %325 = vst [vmem:[#allocation2 + $0x8] sm:$0xff] %v1462_v0  ;;  %202 = vmatprep.mubr.f32.mxu1 %v1462_v0  ;;  %v1543_v4 = vld [vmem:[#allocation4 + $0x18] sm:$0xff]  ;;  %v1343_v5 = vpack.c.bf16 %v1541_v3, %v1539_v2  ;;  %v1547_v6 = vld [vmem:[#allocation4 + $0x48] sm:$0xff]  ;;  %vm63_vm0 = vcmask 130048   ;;  %s1464_s21 = smov 111  }
  0x15   :  { %326 = vst [vmem:[#allocation2 + $0x10] sm:$0xff] %v1462_v0  ;;  %327 = vst [vmem:[#allocation2 + $0x18] sm:$0xff] %v1462_v0  ;;  %1393 = vset.pattern.permute.xlu0 %v1463_v1  ;;  %1394 = vset.pattern.permute.xlu1 %v1463_v1  ;;  %v1549_v7 = vld [vmem:[#allocation4] sm:$0xff]  ;;  %v1551_v8 = vld [vmem:[#allocation4 + $0x30] sm:$0xff]  ;;  %v1347_v9 = vpack.c.bf16 %v1547_v6, %v1543_v4  ;;  %s1466_s22 = smov 110   ;;  %v289_v26 = vshrl.u32 %v288_v25, 7 }
  0x16   :  { %v1345_v10 = vpack.c.bf16 %v1551_v8, %v1549_v7  ;;  %v1557_v11 = vld [vmem:[#allocation4 + $0x10] sm:$0xff]  ;;  %v1559_v12 = vld [vmem:[#allocation4 + $0x40] sm:$0xff]  ;;  %1344 = vmatprep.subr.bf16.mxu0 %v1343_v5  ;;  %v1566_v15 = vld [vmem:[#allocation4 + $0x28] sm:$0xff]  ;;  %s1468_s25 = smov 19   ;;  %s1469_s26 = smov 18   ;;  %vm368_vm1 = vcmask 154624  }
  0x17   :  { %v56_v13 = vld [vmem:[%s1847_s2] sm:$0xf]  ;;  %v1349_v14 = vpack.c.bf16 %v1559_v12, %v1557_v11  ;;  %v1568_v16 = vld [vmem:[#allocation4 + $0x58] sm:$0xff]  ;;  %v1570_v17 = vld [vmem:[#allocation4 + $0x20] sm:$0xff]  ;;  %1348 = vmatprep.subr.bf16.mxu1 %v1347_v9  ;;  %v290_v27 = vsub.s32 0, %v289_v26  ;;  %v298_v28 = vsub.s32 2, %v289_v26 }
  0x18   :  { %1346 = vmatpush1.bf16.msra.mxu0 %v1345_v10  ;;  %v1351_v18 = vpack.c.bf16 %v1568_v16, %v1566_v15  ;;  %v1574_v19 = vld [vmem:[#allocation4 + $0x50] sm:$0xff]  ;;  %v294_v31 = vsub.s32 1, %v289_v26  ;;  %v302_v32 = vsub.s32 3, %v289_v26  ;;  %v306_v39 = vsub.s32 4, %v289_v26  ;;  %s1470_s27 = smov 1   ;;  %s1471_s28 = smov 109  }
  0x19   :  { %v57_v20 = vld [vmem:[%s1848_s3] sm:$0xf]  ;;  %1350 = vmatpush1.bf16.msra.mxu1 %v1349_v14  ;;  %v1353_v21 = vpack.c.bf16 %v1574_v19, %v1570_v17  ;;  %s1465_s3 = smov 127   ;;  %v310_v44 = vsub.s32 5, %v289_v26  ;;  %vm413_vm2 = vcmask 146432   ;;  %vm502_vm3 = vcmask 7168  }
  0x1a   :  { %60 = vperm.xlu0 %1393, %v57_v20   ;;  %1352 = vmatprep.subr.bf16.mxu0 %v1351_v18  ;;  %v286_v30 = vld [vmem:[%s1846_s1] sm:$0x3f]  ;;  %s1467_s1 = smov 17   ;;  %vm457_vm4 = vcmask 138240   ;;  %vm609_vm5 = vcmask 908288   ;;  %vm565_vm6 = vcmask 1039360  }
  0x1b   :  { %1319 = vmatmul.mubr.msk.f32.vlgmr.msra.gmra.mrb[0].mxu0 %vm63_vm0, %v56_v13  ;;  %v291_v35 = vrot.slane %v286_v30, %v290_v27  ;;  %v299_v37 = vrot.slane %v286_v30, %v298_v28  ;;  %v295_v42 = vrot.slane %v286_v30, %v294_v31  ;;  %v303_v47 = vrot.slane %v286_v30, %v302_v32 }
  0x1c   :  { %1320 = vmatmul.mubr.msk.f32.vlgmr.msra.gmra.mrb[0].mxu1 %vm63_vm0, %v56_v13  ;;  %1354 = vmatpush1.bf16.msra.mxu0 %v1353_v21  ;;  %v587_v22 = vld [vmem:[#allocation2 + $0x1c] sm:$0xf]  ;;  %v307_v54 = vrot.slane %v286_v30, %v306_v39  ;;  %v311_v59 = vrot.slane %v286_v30, %v310_v44  ;;  %vm654_vm7 = vcmask 900096   ;;  %vm698_vm8 = vcmask 891904  }
  0x1d   :  { %273 = vmatprep.mubr.f32.mxu0 %v1462_v0  ;;  %841 = vmatprep.mubr.f32.mxu1 %v1462_v0  ;;  %v1395_v23 = vld [vmem:[#allocation2 + $0x1c] ss:$0 sps:$4 sm:$0xff]   ;;  %vm758_vm9 = vcmask 1043456   ;;  %vm754_vm10 = vcmask 293888   ;;  %vm1010_vm11 = vcmask 31744  }
  0x1e   :  { %607 = vrot.lane.b32.xlu0 %v587_v22, %s1464_s21  ;;  %v1396_v24 = vld [vmem:[#allocation2 + $0x1c] ss:$0 sps:$4 sm:$0xff]  }
  0x1f   :  { %1321 = vmatmul.mubr.msk.f32.vlgmr.msra.gmra.mrb[2].mxu0 %vm63_vm0, %v56_v13 }
  0x20   :  { %912 = vmatprep.mubr.f32.mxu0 %v1462_v0 }
  0x22   :  { %563 = vrot.lane.b32.xlu0 %v1395_v23, %s1465_s3 }
  0x26   :  { %652 = vrot.lane.b32.xlu0 %v1396_v24, %s1466_s22 }
  0x99   :  { %v61_v29 = vpop.permute.xlu0 %60 }
  0xee   :  { %v133_v33 = vpop.f32.mrb[0].mxu0 }
  0xef   :  { %v134_v34 = vadd.f32 %v133_v33, %v61_v29  ;;  %v204_v36 = vpop.f32.mrb[0].mxu1  ;;  %v135_v38 = vpop.f32.mrb[1].mxu0 }
  0xf0   :  { %v205_v40 = vadd.f32 %v204_v36, %v61_v29  ;;  %v136_v41 = vadd.f32 %v135_v38, %v61_v29  ;;  %v206_v43 = vpop.f32.mrb[1].mxu1  ;;  %v998_v38 = vld [vmem:[%s1852_s7] sm:$0xff] }
  0xf1   :  { %v280_v45 = vmax.f32 %v134_v34, 0.0  ;;  %v207_v46 = vadd.f32 %v206_v43, %v61_v29 }
  0xf2   :  { %v282_v48 = vmax.f32 %v205_v40, 0.0  ;;  %v281_v49 = vmax.f32 %v136_v41, 0.0  ;;  %v275_v50 = vpop.f32.mrb[2].mxu0  ;;  %v748_v41 = vld [vmem:[%s1850_s5] sm:$0xf] }
  0xf3   :  { %v1590_v51 = vmul.f32 %v291_v35, %v280_v45  ;;  %v283_v52 = vmax.f32 %v207_v46, 0.0  ;;  %v276_v53 = vadd.f32 %v275_v50, %v61_v29  ;;  %v277_v55 = vpop.f32.mrb[3].mxu0  ;;  %v676_v35 = vld [vmem:[#allocation2 + $0x1c] sm:$0xf] }
  0xf4   :  { %v320_v56 = vmul.f32 %v299_v37, %v282_v48  ;;  %v319_v57 = vmul.f32 %v295_v42, %v281_v49  ;;  %v278_v58 = vadd.f32 %v277_v55, %v61_v29  ;;  %v1665_v37 = vpop.permute.xlu0 %607  ;;  %v999_v42 = vld [vmem:[%s1852_s7 + $0x8] sm:$0xff] }
  0xf5   :  { %v321_v60 = vmul.f32 %v303_v47, %v283_v52  ;;  %v284_v61 = vmax.f32 %v276_v53, 0.0  ;;  %v1409_v26 = vcombine.low %v1590_v51, %v1590_v51 }
  0xf6   :  { %v334_v62 = vcombine.low %v1590_v51, %v319_v57  ;;  %v285_v63 = vmax.f32 %v278_v58, 0.0  ;;  %v1405_v10 = vcombine.low %v319_v57, %v319_v57  ;;  %v1408_v25 = vcombine.low %v320_v56, %v320_v56 }
  0xf7   :  { %v335_v1 = vcombine.low %v320_v56, %v321_v60  ;;  %v1593_v5 = vmul.f32 %v307_v54, %v284_v61  ;;  %v1595_v13 = vcombine.low %v321_v60, %v321_v60 }
  0xf8   :  { %340 = vst [vmem:[#allocation2 + $0x4] sm:$0xff] %v334_v62  ;;  %v323_v9 = vmul.f32 %v311_v59, %v285_v63  ;;  %533 = vst [vmem:[#allocation3 + $0x60] sm:$0xf] %v334_v62  ;;  %v1672_v39 = vpop.permute.xlu0 %563 }
  0xf9   :  { %341 = vst [vmem:[#allocation2 + $0xc] sm:$0xff] %v335_v1  ;;  %535 = vst [vmem:[#allocation3 + $0x70] sm:$0xf] %v335_v1  ;;  %v1410_v33 = vcombine.low %v1593_v5, %v1593_v5 }
  0xfa   :  { %v1598_v14 = vcombine.low %v1593_v5, %v323_v9  ;;  %534 = vst [vmem:[#allocation3 + $0x68] sm:$0xf] %v1405_v10  ;;  %536 = vst [vmem:[#allocation3 + $0x78] sm:$0xf] %v1595_v13  ;;  %v1602_v18 = vcombine.low %v323_v9, %v323_v9 }
  0xfc   :  { %342 = vst [vmem:[#allocation2 + $0x14] sm:$0xff] %v1598_v14  ;;  %537 = vst [vmem:[#allocation3 + $0x80] sm:$0xf] %v1598_v14  ;;  %v1678_v40 = vpop.permute.xlu0 %652 }
  0xfd   :  { %538 = vst [vmem:[#allocation3 + $0x88] sm:$0xf] %v1602_v18 }
  0xff   :  { %v387_v21 = vld [vmem:[#allocation2] sm:$0xff] }
 0x100   :  { %v433_v20 = vld [vmem:[#allocation2 + $0x8] sm:$0xff]  ;;  %v351_v22 = vcombine.high %v387_v21, %v387_v21  ;;  %v395_v24 = vcombine.low %v387_v21, %v387_v21 }
 0x101   :  { %447 = vrot.lane.b32.xlu0 %v433_v20, %s1467_s1  ;;  %358 = vrot.lane.b32.xlu1 %v433_v20, %s1468_s25  ;;  %v396_v23 = vcombine.low %v433_v20, %v433_v20  ;;  %v441_v27 = vcombine.high %v433_v20, %v433_v20 }
 0x103   :  { %v345_v28 = vld [vmem:[#allocation2 + $0x10] sm:$0xff]  ;;  %v346_v29 = vld [vmem:[#allocation2 + $0x18] sm:$0xf] }
 0x104   :  { %v435_v30 = vld [vmem:[#allocation2 + $0x18] sm:$0xf]  ;;  %v353_v31 = vcombine.high %v345_v28, %v345_v28  ;;  %v397_v32 = vcombine.low %v345_v28, %v345_v28 }
 0x105   :  { %599 = vrot.lane.b32.xlu0 %v335_v1, %s1464_s21  ;;  %401 = vrot.lane.b32.xlu1 %v387_v21, %s1469_s26  ;;  %v1403_v34 = vld [vmem:[#allocation2 + $0x18] ss:$0 sps:$4 sm:$0xff]  }
 0x106   :  { %v1404_v36 = vld [vmem:[#allocation2 + $0x18] ss:$0 sps:$4 sm:$0xff]  }
 0x109   :  { %595 = vrot.lane.b32.xlu0 %v334_v62, %s1464_s21  ;;  %490 = vrot.lane.b32.xlu1 %v387_v21, %s1470_s27 }
 0x10d   :  { %405 = vrot.lane.b32.xlu0 %v433_v20, %s1469_s26  ;;  %354 = vrot.lane.b32.xlu1 %v387_v21, %s1468_s25 }
 0x111   :  { %494 = vrot.lane.b32.xlu0 %v433_v20, %s1470_s27  ;;  %443 = vrot.lane.b32.xlu1 %v387_v21, %s1467_s1 }
 0x115   :  { %684 = vrot.lane.b32.xlu0 %v334_v62, %s1471_s28  ;;  %553 = vrot.lane.b32.xlu1 %v334_v62, %s1465_s3 }
 0x119   :  { %642 = vrot.lane.b32.xlu1 %v334_v62, %s1466_s22  ;;  %356 = vrot.lane.b32.xlu0 %v351_v22, %s1468_s25 }
 0x11d   :  { %688 = vrot.lane.b32.xlu1 %v335_v1, %s1471_s28  ;;  %403 = vrot.lane.b32.xlu0 %v396_v23, %s1469_s26 }
 0x121   :  { %557 = vrot.lane.b32.xlu1 %v335_v1, %s1465_s3  ;;  %492 = vrot.lane.b32.xlu0 %v396_v23, %s1470_s27 }
 0x125   :  { %646 = vrot.lane.b32.xlu1 %v335_v1, %s1466_s22  ;;  %399 = vrot.lane.b32.xlu0 %v395_v24, %s1469_s26 }
 0x129   :  { %445 = vrot.lane.b32.xlu1 %v351_v22, %s1467_s1  ;;  %488 = vrot.lane.b32.xlu0 %v395_v24, %s1470_s27 }
 0x12d   :  { %597 = vrot.lane.b32.xlu1 %v1405_v10, %s1464_s21  ;;  %555 = vrot.lane.b32.xlu0 %v1408_v25, %s1465_s3 }
 0x131   :  { %551 = vrot.lane.b32.xlu1 %v1409_v26, %s1465_s3  ;;  %644 = vrot.lane.b32.xlu0 %v1408_v25, %s1466_s22 }
 0x135   :  { %640 = vrot.lane.b32.xlu1 %v1409_v26, %s1466_s22  ;;  %360 = vrot.lane.b32.xlu0 %v441_v27, %s1468_s25 }
 0x139   :  { %601 = vrot.lane.b32.xlu1 %v1595_v13, %s1464_s21  ;;  %449 = vrot.lane.b32.xlu0 %v441_v27, %s1467_s1 }
 0x13d   :  { %362 = vrot.lane.b32.xlu1 %v345_v28, %s1468_s25  ;;  %686 = vrot.lane.b32.xlu0 %v1405_v10, %s1471_s28 }
 0x141   :  { %366 = vrot.lane.b32.xlu1 %v346_v29, %s1468_s25  ;;  %409 = vrot.lane.b32.xlu0 %v345_v28, %s1469_s26 }
 0x145   :  { %451 = vrot.lane.b32.xlu1 %v345_v28, %s1467_s1  ;;  %498 = vrot.lane.b32.xlu0 %v345_v28, %s1470_s27 }
 0x149   :  { %455 = vrot.lane.b32.xlu1 %v435_v30, %s1467_s1  ;;  %603 = vrot.lane.b32.xlu0 %v1598_v14, %s1464_s21 }
 0x14d   :  { %561 = vrot.lane.b32.xlu1 %v1598_v14, %s1465_s3  ;;  %364 = vrot.lane.b32.xlu0 %v353_v31, %s1468_s25 }
 0x151   :  { %650 = vrot.lane.b32.xlu1 %v1598_v14, %s1466_s22  ;;  %453 = vrot.lane.b32.xlu0 %v353_v31, %s1467_s1 }
 0x155   :  { %407 = vrot.lane.b32.xlu1 %v397_v32, %s1469_s26  ;;  %559 = vrot.lane.b32.xlu0 %v1410_v33, %s1465_s3 }
 0x159   :  { %411 = vrot.lane.b32.xlu1 %v1403_v34, %s1469_s26  ;;  %648 = vrot.lane.b32.xlu0 %v1410_v33, %s1466_s22 }
 0x15d   :  { %496 = vrot.lane.b32.xlu1 %v397_v32, %s1470_s27  ;;  %692 = vrot.lane.b32.xlu0 %v1598_v14, %s1471_s28 }
 0x161   :  { %500 = vrot.lane.b32.xlu1 %v1404_v36, %s1470_s27  ;;  %696 = vrot.lane.b32.xlu0 %v676_v35, %s1471_s28 }
 0x165   :  { %605 = vrot.lane.b32.xlu1 %v1602_v18, %s1464_s21  ;;  %1002 = vperm.xlu0 %1393, %v998_v38  }
 0x169   :  { %690 = vrot.lane.b32.xlu1 %v1595_v13, %s1471_s28 }
 0x16d   :  { %694 = vrot.lane.b32.xlu1 %v1602_v18, %s1471_s28 }
 0x171   :  { %751 = vperm.xlu1 %1394, %v748_v41  }
 0x173   :  { %v1686_v43 = vpop.permute.xlu0 %447  ;;  %v1688_v44 = vpop.permute.xlu1 %358 }
 0x175   :  { %1007 = vperm.xlu1 %1394, %v999_v42  }
 0x177   :  { %v1690_v45 = vpop.permute.xlu0 %599  ;;  %v402_v46 = vpop.permute.xlu1 %401 }
 0x17b   :  { %v596_v47 = vpop.permute.xlu0 %595  ;;  %v491_v48 = vpop.permute.xlu1 %490 }
 0x17f   :  { %v1692_v49 = vpop.permute.xlu0 %405  ;;  %v355_v50 = vpop.permute.xlu1 %354 }
 0x183   :  { %v1694_v51 = vpop.permute.xlu0 %494  ;;  %v444_v52 = vpop.permute.xlu1 %443 }
 0x187   :  { %v1696_v53 = vpop.permute.xlu0 %684  ;;  %v554_v54 = vpop.permute.xlu1 %553 }
 0x18b   :  { %v1698_v55 = vpop.permute.xlu1 %642  ;;  %v357_v56 = vpop.permute.xlu0 %356 }
 0x18c   :  { %v369_v57 = vsel %vm368_vm1, %v355_v50, %v357_v56  ;;  %v370_v58 = vsel %vm368_vm1, %v357_v56, %v1688_v44 }
 0x18d   :  { %381 = vst [vmem:[#allocation3] sm:$0xf] %v369_v57  ;;  %382 = vst [vmem:[#allocation3 + $0x8] sm:$0xf] %v370_v58 }
 0x18f   :  { %v1703_v59 = vpop.permute.xlu1 %688  ;;  %v404_v60 = vpop.permute.xlu0 %403 }
 0x190   :  { %v415_v61 = vsel %vm413_vm2, %v402_v46, %v404_v60  ;;  %v416_v62 = vsel %vm413_vm2, %v404_v60, %v1692_v49 }
 0x191   :  { %427 = vst [vmem:[#allocation3 + $0x8] sm:$0xf0] %v415_v61  ;;  %428 = vst [vmem:[#allocation3 + $0x10] sm:$0xf0] %v416_v62 }
 0x193   :  { %v1708_v63 = vpop.permute.xlu1 %557  ;;  %v493_v1 = vpop.permute.xlu0 %492 }
 0x194   :  { %v504_v5 = vsel %vm502_vm3, %v491_v48, %v493_v1  ;;  %v505_v9 = vsel %vm502_vm3, %v493_v1, %v1694_v51 }
 0x195   :  { %516 = vst [vmem:[#allocation3 + $0x38] sm:$0xf0] %v504_v5  ;;  %517 = vst [vmem:[#allocation3 + $0x40] sm:$0xf0] %v505_v9 }
 0x197   :  { %v1713_v10 = vpop.permute.xlu1 %646  ;;  %v400_v13 = vpop.permute.xlu0 %399 }
 0x198   :  { %v414_v14 = vsel %vm413_vm2, %v400_v13, %v402_v46  ;;  %v719_v32 = vld [vmem:[#allocation3 + $0x8] sm:$0xff] }
 0x199   :  { %426 = vst [vmem:[#allocation3] sm:$0xf0] %v414_v14 }
 0x19b   :  { %v446_v18 = vpop.permute.xlu1 %445  ;;  %v489_v20 = vpop.permute.xlu0 %488 }
 0x19c   :  { %v458_v21 = vsel %vm457_vm4, %v444_v52, %v446_v18  ;;  %v459_v22 = vsel %vm457_vm4, %v446_v18, %v1686_v43  ;;  %v503_v23 = vsel %vm502_vm3, %v489_v20, %v491_v48 }
 0x19d   :  { %470 = vst [vmem:[#allocation3 + $0x30] sm:$0xf] %v458_v21  ;;  %471 = vst [vmem:[#allocation3 + $0x38] sm:$0xf] %v459_v22  ;;  %v1747_v22 = vld [vmem:[%s1849_s4] sm:$0xf] }
 0x19e   :  { %515 = vst [vmem:[#allocation3 + $0x30] sm:$0xf0] %v503_v23 }
 0x19f   :  { %v598_v24 = vpop.permute.xlu1 %597  ;;  %v556_v25 = vpop.permute.xlu0 %555 }
 0x1a0   :  { %v610_v26 = vsel %vm609_vm5, %v596_v47, %v598_v24  ;;  %v611_v27 = vsel %vm609_vm5, %v598_v24, %v1690_v45  ;;  %v567_v28 = vsel %vm565_vm6, %v554_v54, %v556_v25  ;;  %v568_v29 = vsel %vm565_vm6, %v556_v25, %v1708_v63  ;;  %v718_v38 = vld [vmem:[#allocation3] sm:$0xff] }
 0x1a1   :  { %622 = vst [vmem:[#allocation3 + $0x90] sm:$0xf] %v610_v26  ;;  %623 = vst [vmem:[#allocation3 + $0x98] sm:$0xf] %v611_v27 }
 0x1a2   :  { %579 = vst [vmem:[#allocation3 + $0x68] sm:$0xf0] %v567_v28  ;;  %580 = vst [vmem:[#allocation3 + $0x70] sm:$0xf0] %v568_v29 }
 0x1a3   :  { %v552_v30 = vpop.permute.xlu1 %551  ;;  %v645_v31 = vpop.permute.xlu0 %644 }
 0x1a4   :  { %v566_v33 = vsel %vm565_vm6, %v552_v30, %v554_v54  ;;  %v656_v34 = vsel %vm654_vm7, %v1698_v55, %v645_v31  ;;  %v657_v35 = vsel %vm654_vm7, %v645_v31, %v1713_v10  ;;  %v725_v36 = vld [vmem:[#allocation3 + $0x38] sm:$0xff] }
 0x1a5   :  { %v724_v41 = vld [vmem:[#allocation3 + $0x30] sm:$0xff]  ;;  %578 = vst [vmem:[#allocation3 + $0x60] sm:$0xf0] %v566_v33  ;;  %668 = vst [vmem:[#allocation3 + $0x98] sm:$0xf0] %v656_v34  ;;  %v1355_v42 = vpack.c.bf16 %v725_v36, %v719_v32 }
 0x1a6   :  { %669 = vst [vmem:[#allocation3 + $0xa0] sm:$0xf0] %v657_v35  ;;  %v1357_v46 = vpack.c.bf16 %v724_v41, %v718_v38 }
 0x1a7   :  { %v641_v47 = vpop.permute.xlu1 %640  ;;  %1356 = vmatprep.subr.bf16.mxu1 %v1355_v42  ;;  %v361_v48 = vpop.permute.xlu0 %360 }
 0x1a8   :  { %v655_v50 = vsel %vm654_vm7, %v641_v47, %v1698_v55  ;;  %v371_v52 = vsel %vm368_vm1, %v1688_v44, %v361_v48  ;;  %1358 = vmatpush1.bf16.msra.mxu1 %v1357_v46 }
 0x1a9   :  { %667 = vst [vmem:[#allocation3 + $0x90] sm:$0xf0] %v655_v50  ;;  %383 = vst [vmem:[#allocation3 + $0x10] sm:$0xf] %v371_v52  ;;  %v731_v60 = vld [vmem:[#allocation3 + $0x68] sm:$0xff] }
 0x1ab   :  { %v602_v54 = vpop.permute.xlu1 %601  ;;  %v450_v56 = vpop.permute.xlu0 %449 }
 0x1ac   :  { %v612_v57 = vsel %vm609_vm5, %v1690_v45, %v602_v54  ;;  %v460_v58 = vsel %vm457_vm4, %v1686_v43, %v450_v56  ;;  %v737_v61 = vld [vmem:[#allocation3 + $0x98] sm:$0xff]  ;;  %v730_v9 = vld [vmem:[#allocation3 + $0x60] sm:$0xff] }
 0x1ad   :  { %624 = vst [vmem:[#allocation3 + $0xa0] sm:$0xf] %v612_v57  ;;  %472 = vst [vmem:[#allocation3 + $0x40] sm:$0xf] %v460_v58  ;;  %v1359_v62 = vpack.c.bf16 %v737_v61, %v731_v60 }
 0x1af   :  { %v363_v55 = vpop.permute.xlu1 %362  ;;  %1360 = vmatprep.subr.bf16.mxu1 %v1359_v62  ;;  %v687_v44 = vpop.permute.xlu0 %686 }
 0x1b0   :  { %v372_v1 = vsel %vm368_vm1, %v361_v48, %v363_v55  ;;  %v699_v5 = vsel %vm698_vm8, %v1696_v53, %v687_v44  ;;  %v700_v45 = vsel %vm698_vm8, %v687_v44, %v1703_v59  ;;  %v736_v13 = vld [vmem:[#allocation3 + $0x90] sm:$0xff] }
 0x1b1   :  { %384 = vst [vmem:[#allocation3 + $0x18] sm:$0xf] %v372_v1  ;;  %711 = vst [vmem:[#allocation3 + $0xc0] sm:$0xf] %v699_v5  ;;  %v1361_v43 = vpack.c.bf16 %v736_v13, %v730_v9  ;;  %v720_v9 = vld [vmem:[#allocation3 + $0x10] sm:$0xff] }
 0x1b2   :  { %712 = vst [vmem:[#allocation3 + $0xc8] sm:$0xf] %v700_v45 }
 0x1b3   :  { %v367_v14 = vpop.permute.xlu1 %366  ;;  %1362 = vmatpush1.bf16.msra.mxu1 %v1361_v43  ;;  %v410_v18 = vpop.permute.xlu0 %409 }
 0x1b4   :  { %v726_v62 = vld [vmem:[#allocation3 + $0x40] sm:$0xff] }
 0x1b5   :  { %v1365_v13 = vpack.c.bf16 %v726_v62, %v720_v9 }
 0x1b7   :  { %v452_v20 = vpop.permute.xlu1 %451  ;;  %v499_v21 = vpop.permute.xlu0 %498 }
 0x1b8   :  { %v461_v53 = vsel %vm457_vm4, %v450_v56, %v452_v20  ;;  %v742_v24 = vld [vmem:[#allocation3 + $0xc0] sm:$0xf] }
 0x1b9   :  { %v743_v23 = vld [vmem:[#allocation3 + $0xc8] sm:$0xf]  ;;  %473 = vst [vmem:[#allocation3 + $0x48] sm:$0xf] %v461_v53 }
 0x1ba   :  { %1322 = vmatprep.subr.msk.mxu1 %vm758_vm9, %v743_v23 }
 0x1bb   :  { %1323 = vmatpush1.msk.msra.mxu1 %vm758_vm9, %v742_v24  ;;  %v456_v25 = vpop.permute.xlu1 %455  ;;  %v604_v26 = vpop.permute.xlu0 %603 }
 0x1bc   :  { %1324 = vmatmul.mubr.msk.f32.vlgmr.msra.gmra.mrb[2].mxu1 %vm754_vm10, %v1747_v22  ;;  %v613_v27 = vsel %vm609_vm5, %v602_v54, %v604_v26 }
 0x1bd   :  { %983 = vmatprep.mubr.f32.mxu1 %v1462_v0  ;;  %625 = vst [vmem:[#allocation3 + $0xa8] sm:$0xf] %v613_v27  ;;  %v732_v27 = vld [vmem:[#allocation3 + $0x70] sm:$0xff] }
 0x1bf   :  { %v562_v28 = vpop.permute.xlu1 %561  ;;  %v365_v29 = vpop.permute.xlu0 %364 }
 0x1c0   :  { %v571_v30 = vsel %vm565_vm6, %v562_v28, %v1672_v39  ;;  %v373_v31 = vsel %vm368_vm1, %v363_v55, %v365_v29  ;;  %v374_v32 = vsel %vm368_vm1, %v365_v29, %v367_v14 }
 0x1c1   :  { %583 = vst [vmem:[#allocation3 + $0x88] sm:$0xf0] %v571_v30  ;;  %385 = vst [vmem:[#allocation3 + $0x20] sm:$0xf] %v373_v31 }
 0x1c2   :  { %386 = vst [vmem:[#allocation3 + $0x28] sm:$0xf] %v374_v32 }
 0x1c3   :  { %v651_v33 = vpop.permute.xlu1 %650  ;;  %v454_v34 = vpop.permute.xlu0 %453 }
 0x1c4   :  { %v660_v35 = vsel %vm654_vm7, %v651_v33, %v1678_v40  ;;  %v462_v36 = vsel %vm457_vm4, %v452_v20, %v454_v34  ;;  %v463_v38 = vsel %vm457_vm4, %v454_v34, %v456_v25  ;;  %v738_v20 = vld [vmem:[#allocation3 + $0xa0] sm:$0xff] }
 0x1c5   :  { %672 = vst [vmem:[#allocation3 + $0xb8] sm:$0xf0] %v660_v35  ;;  %474 = vst [vmem:[#allocation3 + $0x50] sm:$0xf] %v462_v36  ;;  %v1369_v29 = vpack.c.bf16 %v738_v20, %v732_v27 }
 0x1c6   :  { %475 = vst [vmem:[#allocation3 + $0x58] sm:$0xf] %v463_v38 }
 0x1c7   :  { %v408_v39 = vpop.permute.xlu1 %407  ;;  %v560_v41 = vpop.permute.xlu0 %559 }
 0x1c8   :  { %v417_v42 = vsel %vm413_vm2, %v1692_v49, %v408_v39  ;;  %v418_v46 = vsel %vm413_vm2, %v408_v39, %v410_v18  ;;  %v569_v47 = vsel %vm565_vm6, %v1708_v63, %v560_v41  ;;  %v570_v48 = vsel %vm565_vm6, %v560_v41, %v562_v28  ;;  %v735_v32 = vld [vmem:[#allocation3 + $0x88] sm:$0xff] }
 0x1c9   :  { %429 = vst [vmem:[#allocation3 + $0x18] sm:$0xf0] %v417_v42  ;;  %430 = vst [vmem:[#allocation3 + $0x20] sm:$0xf0] %v418_v46 }
 0x1ca   :  { %581 = vst [vmem:[#allocation3 + $0x78] sm:$0xf0] %v569_v47  ;;  %582 = vst [vmem:[#allocation3 + $0x80] sm:$0xf0] %v570_v48 }
 0x1cb   :  { %v412_v40 = vpop.permute.xlu1 %411  ;;  %v649_v50 = vpop.permute.xlu0 %648 }
 0x1cc   :  { %v419_v52 = vsel %vm413_vm2, %v410_v18, %v412_v40  ;;  %v658_v54 = vsel %vm654_vm7, %v1713_v10, %v649_v50  ;;  %v659_v49 = vsel %vm654_vm7, %v649_v50, %v651_v33 }
 0x1cd   :  { %431 = vst [vmem:[#allocation3 + $0x28] sm:$0xf0] %v419_v52  ;;  %670 = vst [vmem:[#allocation3 + $0xa8] sm:$0xf0] %v658_v54 }
 0x1ce   :  { %671 = vst [vmem:[#allocation3 + $0xb0] sm:$0xf0] %v659_v49 }
 0x1cf   :  { %v497_v56 = vpop.permute.xlu1 %496  ;;  %v693_v45 = vpop.permute.xlu0 %692 }
 0x1d0   :  { %v506_v63 = vsel %vm502_vm3, %v1694_v51, %v497_v56  ;;  %v507_v57 = vsel %vm502_vm3, %v497_v56, %v499_v21  ;;  %v721_v44 = vld [vmem:[#allocation3 + $0x18] sm:$0xff]  ;;  %v722_v28 = vld [vmem:[#allocation3 + $0x20] sm:$0xff] }
 0x1d1   :  { %518 = vst [vmem:[#allocation3 + $0x48] sm:$0xf0] %v506_v63  ;;  %519 = vst [vmem:[#allocation3 + $0x50] sm:$0xf0] %v507_v57  ;;  %v733_v43 = vld [vmem:[#allocation3 + $0x78] sm:$0xff]  ;;  %v734_v35 = vld [vmem:[#allocation3 + $0x80] sm:$0xff] }
 0x1d2   :  { %v996_v63 = vld [vmem:[%s1851_s6] sm:$0xff] }
 0x1d3   :  { %v501_v58 = vpop.permute.xlu1 %500 }
 0x1d4   :  { %v508_v60 = vsel %vm502_vm3, %v499_v21, %v501_v58  ;;  %v739_v5 = vld [vmem:[#allocation3 + $0xa8] sm:$0xff] }
 0x1d5   :  { %520 = vst [vmem:[#allocation3 + $0x58] sm:$0xf0] %v508_v60  ;;  %v1367_v18 = vpack.c.bf16 %v739_v5, %v733_v43  ;;  %v723_v23 = vld [vmem:[#allocation3 + $0x28] sm:$0xff] }
 0x1d7   :  { %v606_v61 = vpop.permute.xlu1 %605 }
 0x1d8   :  { %v614_v10 = vsel %vm609_vm5, %v604_v26, %v606_v61  ;;  %v615_v55 = vsel %vm609_vm5, %v606_v61, %v1665_v37  ;;  %v727_v1 = vld [vmem:[#allocation3 + $0x48] sm:$0xff]  ;;  %v728_v21 = vld [vmem:[#allocation3 + $0x50] sm:$0xff]  ;;  %v697_v26 = vpop.permute.xlu0 %696 }
 0x1d9   :  { %626 = vst [vmem:[#allocation3 + $0xb0] sm:$0xf] %v614_v10  ;;  %627 = vst [vmem:[#allocation3 + $0xb8] sm:$0xf] %v615_v55  ;;  %v1363_v51 = vpack.c.bf16 %v727_v1, %v721_v44  ;;  %v1373_v30 = vpack.c.bf16 %v728_v21, %v722_v28 }
 0x1db   :  { %v691_v14 = vpop.permute.xlu1 %690  ;;  %1364 = vmatprep.subr.bf16.mxu0 %v1363_v51 }
 0x1dc   :  { %v701_v53 = vsel %vm698_vm8, %v1703_v59, %v691_v14  ;;  %v702_v37 = vsel %vm698_vm8, %v691_v14, %v693_v45  ;;  %1366 = vmatpush1.bf16.msra.mxu0 %v1365_v13  ;;  %v729_v24 = vld [vmem:[#allocation3 + $0x58] sm:$0xff] }
 0x1dd   :  { %713 = vst [vmem:[#allocation3 + $0xd0] sm:$0xf] %v701_v53  ;;  %714 = vst [vmem:[#allocation3 + $0xd8] sm:$0xf] %v702_v37  ;;  %1368 = vmatprep.subr.bf16.mxu0 %v1367_v18  ;;  %v1371_v25 = vpack.c.bf16 %v729_v24, %v723_v23 }
 0x1df   :  { %v695_v31 = vpop.permute.xlu1 %694  ;;  %1372 = vmatprep.subr.bf16.mxu1 %v1371_v25 }
 0x1e0   :  { %v703_v33 = vsel %vm698_vm8, %v693_v45, %v695_v31  ;;  %v704_v59 = vsel %vm698_vm8, %v695_v31, %v697_v26  ;;  %1370 = vmatpush1.bf16.msra.mxu0 %v1369_v29  ;;  %1374 = vmatpush1.bf16.msra.mxu1 %v1373_v30  ;;  %v741_v34 = vld [vmem:[#allocation3 + $0xb8] sm:$0xff]  ;;  %v740_v36 = vld [vmem:[#allocation3 + $0xb0] sm:$0xff] }
 0x1e1   :  { %715 = vst [vmem:[#allocation3 + $0xe0] sm:$0xf] %v703_v33  ;;  %716 = vst [vmem:[#allocation3 + $0xe8] sm:$0xf] %v704_v59  ;;  %v1375_v38 = vpack.c.bf16 %v741_v34, %v735_v32  ;;  %v1377_v39 = vpack.c.bf16 %v740_v36, %v734_v35 }
 0x1e3   :  { %1376 = vmatprep.subr.bf16.mxu1 %v1375_v38 }
 0x1e4   :  { %1378 = vmatpush1.bf16.msra.mxu1 %v1377_v39  ;;  %v745_v41 = vld [vmem:[#allocation3 + $0xd8] sm:$0xf]  ;;  %v744_v42 = vld [vmem:[#allocation3 + $0xd0] sm:$0xf]  ;;  %v1003_v9 = vpop.permute.xlu0 %1002 }
 0x1e5   :  { %1325 = vmatprep.subr.msk.mxu0 %vm758_vm9, %v745_v41 }
 0x1e6   :  { %1326 = vmatpush1.msk.msra.mxu0 %vm758_vm9, %v744_v42 }
 0x1e7   :  { %1327 = vmatmul.mubr.msk.f32.vlgmr.msra.gmra.mrb[4].mxu0 %vm754_vm10, %v1747_v22 }
 0x1e8   :  { %v747_v46 = vld [vmem:[#allocation3 + $0xe8] sm:$0xf]  ;;  %v746_v47 = vld [vmem:[#allocation3 + $0xe0] sm:$0xf]  ;;  %1099 = vmatprep.mubr.f32.mxu0 %v1462_v0 }
 0x1e9   :  { %1328 = vmatprep.subr.msk.mxu1 %vm758_vm9, %v747_v46 }
 0x1ea   :  { %1329 = vmatpush1.msk.msra.mxu1 %vm758_vm9, %v746_v47 }
 0x1eb   :  { %1330 = vmatmul.mubr.msk.f32.vlgmr.msra.gmra.mrb[4].mxu1 %vm754_vm10, %v1747_v22  ;;  %v997_v22 = vld [vmem:[%s1851_s6 + $0x8] sm:$0xff]  ;;  %s1472_s6 = smov [#allocation7]  }
 0x1ec   :  { %1176 = vmatprep.mubr.f32.mxu1 %v1462_v0  ;;  %s1307_s18 = sshll.u32 %s1472_s6, 4  ;;  %s1308_s18 = int_to_ptr.vmem [resolvable:$true] %s1307_s18 }
 0x1ed   :  { %s1433_s0 = scalar_lea.vmem %s1308_s18, 1536  ;;  %p1438_p9 = scmp.lt.s32.totalorder %s1308_s18, %s1308_s18 }
 0x1ee   :  { %p1434_p8 = scmp.ne.s32.totalorder %s1308_s18, %s1433_s0  ;;  %p1439_p10 = scmp.lt.s32.totalorder %s1433_s0, %s1433_s0 }
 0x1f0   :  { %v752_v48 = vpop.permute.xlu1 %751  ;;  %p1440_p11 = por %p1439_p10, %p1438_p9 }
 0x1f2   :  { %p1441_p12 = pnand %p1440_p11, %p1434_p8 }
 0x1f4   :  { %v1008_v21 = vpop.permute.xlu1 %1007 }
 0x28f   :  { %v843_v40 = vpop.f32.mrb[2].mxu1 }
 0x290   :  { %v844_v50 = vadd.f32 %v843_v40, %v752_v48  ;;  %v845_v52 = vpop.f32.mrb[3].mxu1 }
 0x291   :  { %v846_v54 = vadd.f32 %v845_v52, %v752_v48 }
 0x292   :  { %v990_v49 = vmax.f32 %v844_v50, 0.0 }
 0x293   :  { %v991_v56 = vmax.f32 %v846_v54, 0.0 }
 0x295   :  { %1331 = vmatprep.subr.msk.mxu0 %vm758_vm9, %v991_v56 }
 0x296   :  { %1332 = vmatpush1.msk.msra.mxu0 %vm758_vm9, %v990_v49 }
 0x297   :  { %1333 = vmatmul.mubr.msk.f32.vlgmr.msra.gmra.mrb[6].mxu0 %vm1010_vm11, %v996_v63 }
 0x298   :  { %1105 = vmatprep.mubr.f32.mxu0 %v1462_v0 }
 0x29b   :  { %1334 = vmatmul.mubr.msk.f32.gmra.mrb[8].mxu0 %vm1010_vm11, %v997_v22 }
 0x29c   :  { %1253 = vmatprep.mubr.f32.mxu0 %v1462_v0 }
 0x2ba   :  { %v914_v57 = vpop.f32.mrb[4].mxu0 }
 0x2bb   :  { %v915_v58 = vadd.f32 %v914_v57, %v752_v48  ;;  %v916_v60 = vpop.f32.mrb[5].mxu0 }
 0x2bc   :  { %v917_v61 = vadd.f32 %v916_v60, %v752_v48 }
 0x2bd   :  { %v992_v55 = vmax.f32 %v915_v58, 0.0 }
 0x2be   :  { %v993_v62 = vmax.f32 %v917_v61, 0.0  ;;  %v985_v10 = vpop.f32.mrb[4].mxu1 }
 0x2bf   :  { %v986_v44 = vadd.f32 %v985_v10, %v752_v48  ;;  %v987_v1 = vpop.f32.mrb[5].mxu1 }
 0x2c0   :  { %v988_v5 = vadd.f32 %v987_v1, %v752_v48  ;;  %1335 = vmatprep.subr.msk.mxu1 %vm758_vm9, %v993_v62 }
 0x2c1   :  { %1336 = vmatpush1.msk.msra.mxu1 %vm758_vm9, %v992_v55  ;;  %v994_v51 = vmax.f32 %v986_v44, 0.0 }
 0x2c2   :  { %v995_v45 = vmax.f32 %v988_v5, 0.0  ;;  %1337 = vmatmul.mubr.msk.f32.vlgmr.msra.gmra.mrb[6].mxu1 %vm1010_vm11, %v996_v63 }
 0x2c3   :  { %1182 = vmatprep.mubr.f32.mxu1 %v1462_v0 }
 0x2c4   :  { %1339 = vmatprep.subr.msk.mxu0 %vm758_vm9, %v995_v45 }
 0x2c5   :  { %1340 = vmatpush1.msk.msra.mxu0 %vm758_vm9, %v994_v51 }
 0x2c6   :  { %1338 = vmatmul.mubr.msk.f32.gmra.mrb[8].mxu1 %vm1010_vm11, %v997_v22  ;;  %1341 = vmatmul.mubr.msk.f32.vlgmr.msra.gmra.mrb[10].mxu0 %vm1010_vm11, %v996_v63 }
 0x2c7   :  { %1259 = vmatprep.mubr.f32.mxu0 %v1462_v0 }
 0x2ca   :  { %1342 = vmatmul.mubr.msk.f32.gmra.mrb[12].mxu0 %vm1010_vm11, %v997_v22 }
 0x36a   :  { %v1101_v13 = vpop.f32.mrb[6].mxu0 }
 0x36b   :  { %v1102_v43 = vadd.f32 %v1101_v13, %v1003_v9  ;;  %v1103_v14 = vpop.f32.mrb[7].mxu0 }
 0x36c   :  { %v1104_v18 = vadd.f32 %v1103_v14, %v1003_v9 }
 0x36d   :  { %v1266_v20 = vadd.f32 %v1102_v43, %v1549_v7 }
 0x36e   :  { %v1267_v53 = vadd.f32 %v1104_v18, %v1539_v2  ;;  %v1107_v37 = vpop.f32.mrb[8].mxu0 }
 0x36f   :  { %v1278_v23 = vmax.f32 %v1266_v20, 0.0  ;;  %v1108_v24 = vadd.f32 %v1107_v37, %v1008_v21  ;;  %v1109_v25 = vpop.f32.mrb[9].mxu0 }
 0x370   :  { %v1279_v26 = vmax.f32 %v1267_v53, 0.0  ;;  %v1110_v27 = vadd.f32 %v1109_v25, %v1008_v21 }
 0x371   :  { %1290 = vst [vmem:[#allocation7] sm:$0xff] %v1278_v23  ;;  %v1272_v0 = vadd.f32 %v1108_v24, %v1551_v8 }
 0x372   :  { %1291 = vst [vmem:[#allocation7 + $0x8] sm:$0xff] %v1279_v26  ;;  %v1273_v28 = vadd.f32 %v1110_v27, %v1541_v3 }
 0x373   :  { %v1284_v29 = vmax.f32 %v1272_v0, 0.0 }
 0x374   :  { %v1285_v30 = vmax.f32 %v1273_v28, 0.0 }
 0x375   :  { %1296 = vst [vmem:[#allocation7 + $0x30] sm:$0xff] %v1284_v29 }
 0x376   :  { %1297 = vst [vmem:[#allocation7 + $0x38] sm:$0xff] %v1285_v30 }
 0x395   :  { %v1178_v7 = vpop.f32.mrb[6].mxu1 }
 0x396   :  { %v1179_v31 = vadd.f32 %v1178_v7, %v1003_v9  ;;  %v1180_v32 = vpop.f32.mrb[7].mxu1 }
 0x397   :  { %v1181_v2 = vadd.f32 %v1180_v32, %v1003_v9 }
 0x398   :  { %v1268_v33 = vadd.f32 %v1179_v31, %v1557_v11 }
 0x399   :  { %v1269_v59 = vadd.f32 %v1181_v2, %v1543_v4  ;;  %v1184_v34 = vpop.f32.mrb[8].mxu1  ;;  %v1255_v35 = vpop.f32.mrb[10].mxu0 }
 0x39a   :  { %v1280_v36 = vmax.f32 %v1268_v33, 0.0  ;;  %v1185_v38 = vadd.f32 %v1184_v34, %v1008_v21  ;;  %v1256_v8 = vadd.f32 %v1255_v35, %v1003_v9  ;;  %v1186_v39 = vpop.f32.mrb[9].mxu1  ;;  %v1257_v41 = vpop.f32.mrb[11].mxu0 }
 0x39b   :  { %v1281_v3 = vmax.f32 %v1269_v59, 0.0  ;;  %v1187_v42 = vadd.f32 %v1186_v39, %v1008_v21  ;;  %v1258_v46 = vadd.f32 %v1257_v41, %v1003_v9 }
 0x39c   :  { %1292 = vst [vmem:[#allocation7 + $0x10] sm:$0xff] %v1280_v36  ;;  %v1274_v47 = vadd.f32 %v1185_v38, %v1559_v12  ;;  %v1270_v48 = vadd.f32 %v1256_v8, %v1570_v17 }
 0x39d   :  { %1293 = vst [vmem:[#allocation7 + $0x18] sm:$0xff] %v1281_v3  ;;  %v1275_v11 = vadd.f32 %v1187_v42, %v1547_v6  ;;  %v1271_v4 = vadd.f32 %v1258_v46, %v1566_v15  ;;  %v1261_v40 = vpop.f32.mrb[12].mxu0 }
 0x39e   :  { %v1286_v50 = vmax.f32 %v1274_v47, 0.0  ;;  %v1282_v52 = vmax.f32 %v1270_v48, 0.0  ;;  %v1262_v54 = vadd.f32 %v1261_v40, %v1008_v21  ;;  %v1263_v49 = vpop.f32.mrb[13].mxu0 }
 0x39f   :  { %v1287_v56 = vmax.f32 %v1275_v11, 0.0  ;;  %v1283_v63 = vmax.f32 %v1271_v4, 0.0  ;;  %v1264_v22 = vadd.f32 %v1263_v49, %v1008_v21 }
 0x3a0   :  { %1298 = vst [vmem:[#allocation7 + $0x40] sm:$0xff] %v1286_v50  ;;  %1294 = vst [vmem:[#allocation7 + $0x20] sm:$0xff] %v1282_v52  ;;  %v1276_v57 = vadd.f32 %v1262_v54, %v1574_v19 }
 0x3a1   :  { %1299 = vst [vmem:[#allocation7 + $0x48] sm:$0xff] %v1287_v56  ;;  %1295 = vst [vmem:[#allocation7 + $0x28] sm:$0xff] %v1283_v63  ;;  %v1277_v6 = vadd.f32 %v1264_v22, %v1568_v16 }
 0x3a2   :  { %v1288_v12 = vmax.f32 %v1276_v57, 0.0 }
 0x3a3   :  { %v1289_v15 = vmax.f32 %v1277_v6, 0.0 }
 0x3a4   :  { %1300 = vst [vmem:[#allocation7 + $0x50] sm:$0xff] %v1288_v12 }
 0x3a5   :  { %1301 = vst [vmem:[#allocation7 + $0x58] sm:$0xff] %v1289_v15 }
 0x3a6   :  { %1444 = shalt.err (!%p1441_p12)
}
 0x3a7   :  { %s1445_s2 = scalar_lea.hbm %s1853_s8, 1536 }
 0x3a8   :  { %p1446_p13 = scmp.ne.s32.totalorder %s1853_s8, %s1445_s2  ;;  %p1449_p0 = scmp.lt.u32.totalorder %s1445_s2, %s1853_s8 }
 0x3aa   :  { %p1451_p1 = pnand %p1449_p0, %p1446_p13 }
 0x3ac   :  { %1454 = shalt.err (!%p1451_p1)
}
 0x3ad   :  { %1313 = dma.vmem_to_hbm [thread:$0]  %s1308_s18, 1536, %s1853_s8, [#allocation6], %s1460_s15, %s1460_s15, %s1461_s16  }
 0x3ae   :  { %1457 = dma.done.wait [#allocation6], 1536  }
 0x3af   :  { %1458 = vsyncadd [#allocation6], 4294965760 }
 0x3b0   :  { %1317 = vsyncpa [#allocation5], 1 }
 0x3b1   :  { %1318 = vsyncpa [#allocation6], 1 }

</bundles_post_ra>
